<compile_context>
chip_gen: v5e
topology: v5e:2x2
jax: 0.10.0
libtpu: 0.0.40
codegen_flags: <defaults>
</compile_context>

<pallas_src>
import functools

import jax
import jax.numpy as jnp
from jax.experimental import pallas as pl
from jax.experimental.pallas import tpu as pltpu

r = 5
R = 96
INPUT_DIM = r                  # 5
OUTPUT_DIM = R - r             # 91
OUT_PAD = 128                  # lane-dense output width (sliced back to 91 outside)
DIMS = [INPUT_DIM, 32, 64, 128, 256, 256, OUTPUT_DIM]
# Widths the kernel actually computes (final layer padded to 128 lanes).
KERNEL_DIMS = [INPUT_DIM, 32, 64, 128, 256, 256, OUT_PAD]

# Covers the TB=2048 footprint (~12 MiB: resident weights + double-buffered
# lane-padded x/out tiles + (TB,256) f32 accumulator temporaries) on every
# generation, incl. v5e's 16 MiB scoped default and v7x's 64 MiB physical VMEM.
VMEM_LIMIT_BYTES = 32 * 1024 * 1024


def _elu_to_bf16(v):
    """nn.ELU (alpha=1) in f32, result handed to the next MXU layer as bf16.

    * Compare/select/exp stay f32: MXU is the binding unit (VPU/EUP have
      slack) and v5e has no bf16 VALU/EUP.
    * exp(v) - 1.0 instead of expm1: in f32 the absolute error near v -> 0-
      is <= ~1.2e-7, far below the bf16 rounding (~4e-3 relative) the value
      receives one line later, and exp is a guaranteed Mosaic lowering.
    """
    return jnp.where(v > 0, v, jnp.exp(v) - 1.0).astype(jnp.bfloat16)


def pod_ann_kernel(x_ref,
                   w1, b1, w2, b2, w3, b3, w4, b4, w5, b5, w6, b6,
                   o_ref):
    x = x_ref[...]                            # (TB, 5) f32

    # ---- layer 1: K=5 contraction as rank-1 VPU FMAs (MXU would be ~4% used) ----
    w1v = w1[...]                             # (5, 32) f32
    h = b1[...] + x[:, 0:1] * w1v[0:1, :]     # (TB, 32) f32
    for k in range(1, INPUT_DIM):
        h = h + x[:, k:k + 1] * w1v[k:k + 1, :]
    h = _elu_to_bf16(h)

    # ---- layers 2..6: bf16 MXU matmuls, f32 accumulation + f32 bias ----
    def dense(v_bf16, w_ref, b_ref):
        return (jnp.dot(v_bf16, w_ref[...],
                        preferred_element_type=jnp.float32) + b_ref[...])

    h = _elu_to_bf16(dense(h, w2, b2))
    h = _elu_to_bf16(dense(h, w3, b3))
    h = _elu_to_bf16(dense(h, w4, b4))
    h = _elu_to_bf16(dense(h, w5, b5))
    # Final layer: (TB, 128) f32; columns 91..127 are zero (padded weights/bias).
    o_ref[...] = dense(h, w6, b6)


def _round_up(n, m):
    return ((n + m - 1) // m) * m


def _cdiv(a, b):
    return -(-a // b)


def _choose_tile(batch, block_batch):
    """Batch-derived tiling.  Returns (tile_rows, num_tiles)."""
    # Enough tiles that each holds <= block_batch rows.
    n_tiles = max(1, _cdiv(batch, block_batch))
    # v7x megacore: ensure both TensorCores get work whenever there is enough
    # batch to split into two rows-of-8 tiles; an even count balances cores.
    if n_tiles < 2 and batch >= 16:
        n_tiles = 2
    if n_tiles > 1 and n_tiles % 2 == 1:
        n_tiles += 1
    # Tile = ceil(batch / n_tiles) rounded to the f32 sublane multiple (8):
    # padding waste is a handful of rows, not up to block_batch - 1.
    tb = _round_up(_cdiv(batch, n_tiles), 8)
    n_tiles = _cdiv(batch, tb)
    return tb, n_tiles


def _prepare_kernel_params(params):
    """Layer 1 stays f32 (VPU path); MXU layers cast to bf16; last layer padded
    to a lane-dense 128 columns (zeros beyond 91)."""
    (w1, b1), (w2, b2), (w3, b3), (w4, b4), (w5, b5), (w6, b6) = params
    w2b, w3b, w4b, w5b = (w.astype(jnp.bfloat16) for w in (w2, w3, w4, w5))
    w6p = jnp.zeros((w6.shape[0], OUT_PAD), jnp.bfloat16)
    w6p = w6p.at[:, :OUTPUT_DIM].set(w6.astype(jnp.bfloat16))
    b6p = jnp.zeros((1, OUT_PAD), jnp.float32).at[:, :OUTPUT_DIM].set(b6)
    return [w1, b1, w2b, b2, w3b, b3, w4b, b4, w5b, b5, w6p, b6p]


@functools.partial(jax.jit, static_argnames=("block_batch",))
def pod_ann_forward(x, params, block_batch=2048):
    batch = x.shape[0]
    flat = _prepare_kernel_params(params)

    tb, n_tiles = _choose_tile(batch, block_batch)
    padded = tb * n_tiles
    if padded != batch:
        x = jnp.pad(x, ((0, padded - batch), (0, 0)))

    # Weights/biases: full-array blocks with constant index maps -> DMA'd once
    # and VMEM-resident across all grid steps.
    weight_specs = [pl.BlockSpec(p.shape, lambda i: (0, 0)) for p in flat]

    # Advisory cost matching the actually-computed padded shapes.
    flops = 2 * padded * sum(KERNEL_DIMS[i] * KERNEL_DIMS[i + 1]
                             for i in range(len(KERNEL_DIMS) - 1))
    transcendentals = padded * sum(KERNEL_DIMS[1:-1])   # one exp per ELU element
    weight_bytes = sum(int(p.size) * p.dtype.itemsize for p in flat)
    bytes_accessed = padded * (INPUT_DIM + OUT_PAD) * 4 + weight_bytes

    out = pl.pallas_call(
        pod_ann_kernel,
        out_shape=jax.ShapeDtypeStruct((padded, OUT_PAD), jnp.float32),
        grid=(n_tiles,),
        in_specs=[pl.BlockSpec((tb, INPUT_DIM), lambda i: (i, 0))] + weight_specs,
        out_specs=pl.BlockSpec((tb, OUT_PAD), lambda i: (i, 0)),
        compiler_params=pltpu.CompilerParams(
            dimension_semantics=("parallel",),
            vmem_limit_bytes=VMEM_LIMIT_BYTES),
        cost_estimate=pl.CostEstimate(
            flops=flops,
            transcendentals=transcendentals,
            bytes_accessed=bytes_accessed),
    )(x, *flat)
    return out[:batch, :OUTPUT_DIM]


def init_params(key):
    """Deterministic init mimicking torch.nn.Linear (uniform +-1/sqrt(fan_in)).

    Weights stored (in_features, out_features); biases as (1, out). f32 master."""
    params = []
    for i in range(len(DIMS) - 1):
        fan_in, fan_out = DIMS[i], DIMS[i + 1]
        key, kw, kb = jax.random.split(key, 3)
        bound = 1.0 / jnp.sqrt(jnp.float32(fan_in))
        w = jax.random.uniform(kw, (fan_in, fan_out), jnp.float32,
                               minval=-bound, maxval=bound)
        b = jax.random.uniform(kb, (1, fan_out), jnp.float32,
                               minval=-bound, maxval=bound)
        params.append((w, b))
    return params


def pod_ann_reference_f32(x, params):
    """Pure f32 reference (original module semantics)."""
    h = x
    for i, (w, b) in enumerate(params):
        h = h @ w + b
        if i < len(params) - 1:
            h = jnp.where(h > 0, h, jnp.exp(h) - 1.0)
    return h


def pod_ann_reference_matched(x, params):
    """Reference mirroring the kernel's precision: f32 layer 1, bf16 MXU layers
    with f32 accumulation, f32 ELU."""
    (w1, b1) = params[0]
    h = x @ w1 + b1
    h = jnp.where(h > 0, h, jnp.exp(h) - 1.0)
    rest = params[1:]
    for i, (w, b) in enumerate(rest):
        h = jnp.dot(h.astype(jnp.bfloat16), w.astype(jnp.bfloat16),
                    preferred_element_type=jnp.float32) + b
        if i < len(rest) - 1:
            h = jnp.where(h > 0, h, jnp.exp(h) - 1.0)
    return h


if __name__ == "__main__":
    key = jax.random.PRNGKey(0)
    kx, kp, kx2 = jax.random.split(key, 3)

    params = init_params(kp)

    # ---- small single-tile case ----
    batch = 8
    x = jax.random.normal(kx, (batch, INPUT_DIM), dtype=jnp.float32)
    out = jax.block_until_ready(pod_ann_forward(x, params))
    assert out.shape == (batch, OUTPUT_DIM)

    # Tight check against a precision-matched reference (bf16 MXU, f32 acc).
    ref_matched = pod_ann_reference_matched(x, params)
    assert jnp.allclose(out, ref_matched, atol=2e-3, rtol=2e-3), \
        float(jnp.max(jnp.abs(out - ref_matched)))

    # Loose sanity check against pure-f32 module semantics (bf16 matmul inputs
    # are an intentional deviation; error compounds to ~1e-2 abs across layers).
    ref_f32 = pod_ann_reference_f32(x, params)
    assert jnp.allclose(out, ref_f32, atol=1e-1, rtol=1e-1), \
        float(jnp.max(jnp.abs(out - ref_f32)))

    # ---- multi-tile / ragged case: exercises batch-derived tiling, >=2 grid
    #      steps (megacore path), row padding + output slicing ----
    batch2 = 50
    x2 = jax.random.normal(kx2, (batch2, INPUT_DIM), dtype=jnp.float32)
    out2 = jax.block_until_ready(pod_ann_forward(x2, params, block_batch=16))
    assert out2.shape == (batch2, OUTPUT_DIM)
    ref2 = pod_ann_reference_matched(x2, params)
    assert jnp.allclose(out2, ref2, atol=2e-3, rtol=2e-3), \
        float(jnp.max(jnp.abs(out2 - ref2)))

    print("KERNEL_OK")
</pallas_src>

<mosaic_0001>
module attributes {stable_mosaic.version = 11 : i64} {
  func.func @pod_ann_kernel(%arg0: i32, %arg1: memref<8x5xf32, #tpu.memory_space<vmem>>, %arg2: memref<5x32xf32, #tpu.memory_space<vmem>>, %arg3: memref<1x32xf32, #tpu.memory_space<vmem>>, %arg4: memref<32x64xbf16, #tpu.memory_space<vmem>>, %arg5: memref<1x64xf32, #tpu.memory_space<vmem>>, %arg6: memref<64x128xbf16, #tpu.memory_space<vmem>>, %arg7: memref<1x128xf32, #tpu.memory_space<vmem>>, %arg8: memref<128x256xbf16, #tpu.memory_space<vmem>>, %arg9: memref<1x256xf32, #tpu.memory_space<vmem>>, %arg10: memref<256x256xbf16, #tpu.memory_space<vmem>>, %arg11: memref<1x256xf32, #tpu.memory_space<vmem>>, %arg12: memref<256x128xbf16, #tpu.memory_space<vmem>>, %arg13: memref<1x128xf32, #tpu.memory_space<vmem>>, %arg14: memref<8x128xf32, #tpu.memory_space<vmem>>) attributes {dimension_semantics = [#tpu.dimension_semantics<parallel>], iteration_bounds = array<i64: 1>, scalar_prefetch = 0 : i64, scratch_operands = 0 : i64, tpu.core_type = #tpu.core_type<tc>, window_params = [{transform_indices = @transform_0, window_bounds = array<i64: 8, 5>}, {pipeline_mode = #tpu.pipeline_mode<synchronous>, transform_indices = @transform_1, window_bounds = array<i64: 5, 32>}, {pipeline_mode = #tpu.pipeline_mode<synchronous>, transform_indices = @transform_2, window_bounds = array<i64: 1, 32>}, {pipeline_mode = #tpu.pipeline_mode<synchronous>, transform_indices = @transform_3, window_bounds = array<i64: 32, 64>}, {pipeline_mode = #tpu.pipeline_mode<synchronous>, transform_indices = @transform_4, window_bounds = array<i64: 1, 64>}, {pipeline_mode = #tpu.pipeline_mode<synchronous>, transform_indices = @transform_5, window_bounds = array<i64: 64, 128>}, {pipeline_mode = #tpu.pipeline_mode<synchronous>, transform_indices = @transform_6, window_bounds = array<i64: 1, 128>}, {pipeline_mode = #tpu.pipeline_mode<synchronous>, transform_indices = @transform_7, window_bounds = array<i64: 128, 256>}, {pipeline_mode = #tpu.pipeline_mode<synchronous>, transform_indices = @transform_8, window_bounds = array<i64: 1, 256>}, {pipeline_mode = #tpu.pipeline_mode<synchronous>, transform_indices = @transform_9, window_bounds = array<i64: 256, 256>}, {pipeline_mode = #tpu.pipeline_mode<synchronous>, transform_indices = @transform_10, window_bounds = array<i64: 1, 256>}, {pipeline_mode = #tpu.pipeline_mode<synchronous>, transform_indices = @transform_11, window_bounds = array<i64: 256, 128>}, {pipeline_mode = #tpu.pipeline_mode<synchronous>, transform_indices = @transform_12, window_bounds = array<i64: 1, 128>}, {transform_indices = @transform_13, window_bounds = array<i64: 8, 128>}]} {
    %c0 = arith.constant 0 : index
    %c0_0 = arith.constant 0 : index
    %0 = vector.load %arg1[%c0, %c0_0] : memref<8x5xf32, #tpu.memory_space<vmem>>, vector<8x5xf32>
    %c0_1 = arith.constant 0 : index
    %c0_2 = arith.constant 0 : index
    %1 = vector.load %arg2[%c0_1, %c0_2] : memref<5x32xf32, #tpu.memory_space<vmem>>, vector<5x32xf32>
    %c0_3 = arith.constant 0 : index
    %c0_4 = arith.constant 0 : index
    %2 = vector.load %arg3[%c0_3, %c0_4] : memref<1x32xf32, #tpu.memory_space<vmem>>, vector<1x32xf32>
    %3 = vector.extract_strided_slice %0 {offsets = [0, 0], sizes = [8, 1], strides = [1, 1]} : vector<8x5xf32> to vector<8x1xf32>
    %4 = vector.extract_strided_slice %1 {offsets = [0, 0], sizes = [1, 32], strides = [1, 1]} : vector<5x32xf32> to vector<1x32xf32>
    %5 = vector.broadcast %3 : vector<8x1xf32> to vector<8x32xf32>
    %6 = vector.broadcast %4 : vector<1x32xf32> to vector<8x32xf32>
    %7 = arith.mulf %5, %6 : vector<8x32xf32>
    %8 = vector.broadcast %2 : vector<1x32xf32> to vector<8x32xf32>
    %9 = arith.addf %8, %7 : vector<8x32xf32>
    %10 = vector.extract_strided_slice %0 {offsets = [0, 1], sizes = [8, 1], strides = [1, 1]} : vector<8x5xf32> to vector<8x1xf32>
    %11 = vector.extract_strided_slice %1 {offsets = [1, 0], sizes = [1, 32], strides = [1, 1]} : vector<5x32xf32> to vector<1x32xf32>
    %12 = vector.broadcast %10 : vector<8x1xf32> to vector<8x32xf32>
    %13 = vector.broadcast %11 : vector<1x32xf32> to vector<8x32xf32>
    %14 = arith.mulf %12, %13 : vector<8x32xf32>
    %15 = arith.addf %9, %14 : vector<8x32xf32>
    %16 = vector.extract_strided_slice %0 {offsets = [0, 2], sizes = [8, 1], strides = [1, 1]} : vector<8x5xf32> to vector<8x1xf32>
    %17 = vector.extract_strided_slice %1 {offsets = [2, 0], sizes = [1, 32], strides = [1, 1]} : vector<5x32xf32> to vector<1x32xf32>
    %18 = vector.broadcast %16 : vector<8x1xf32> to vector<8x32xf32>
    %19 = vector.broadcast %17 : vector<1x32xf32> to vector<8x32xf32>
    %20 = arith.mulf %18, %19 : vector<8x32xf32>
    %21 = arith.addf %15, %20 : vector<8x32xf32>
    %22 = vector.extract_strided_slice %0 {offsets = [0, 3], sizes = [8, 1], strides = [1, 1]} : vector<8x5xf32> to vector<8x1xf32>
    %23 = vector.extract_strided_slice %1 {offsets = [3, 0], sizes = [1, 32], strides = [1, 1]} : vector<5x32xf32> to vector<1x32xf32>
    %24 = vector.broadcast %22 : vector<8x1xf32> to vector<8x32xf32>
    %25 = vector.broadcast %23 : vector<1x32xf32> to vector<8x32xf32>
    %26 = arith.mulf %24, %25 : vector<8x32xf32>
    %27 = arith.addf %21, %26 : vector<8x32xf32>
    %28 = vector.extract_strided_slice %0 {offsets = [0, 4], sizes = [8, 1], strides = [1, 1]} : vector<8x5xf32> to vector<8x1xf32>
    %29 = vector.extract_strided_slice %1 {offsets = [4, 0], sizes = [1, 32], strides = [1, 1]} : vector<5x32xf32> to vector<1x32xf32>
    %30 = vector.broadcast %28 : vector<8x1xf32> to vector<8x32xf32>
    %31 = vector.broadcast %29 : vector<1x32xf32> to vector<8x32xf32>
    %32 = arith.mulf %30, %31 : vector<8x32xf32>
    %33 = arith.addf %27, %32 : vector<8x32xf32>
    %cst = arith.constant 0.000000e+00 : f32
    %34 = vector.broadcast %cst : f32 to vector<8x32xf32>
    %35 = arith.cmpf ogt, %33, %34 : vector<8x32xf32>
    %36 = math.exp %33 : vector<8x32xf32>
    %cst_5 = arith.constant 1.000000e+00 : f32
    %37 = vector.broadcast %cst_5 : f32 to vector<8x32xf32>
    %38 = arith.subf %36, %37 : vector<8x32xf32>
    %39 = arith.select %35, %33, %38 : vector<8x32xi1>, vector<8x32xf32>
    %40 = arith.truncf %39 : vector<8x32xf32> to vector<8x32xbf16>
    %c0_6 = arith.constant 0 : index
    %c0_7 = arith.constant 0 : index
    %41 = vector.load %arg4[%c0_6, %c0_7] : memref<32x64xbf16, #tpu.memory_space<vmem>>, vector<32x64xbf16>
    %cst_8 = arith.constant dense<0.000000e+00> : vector<8x64xf32>
    %42 = tpu.matmul %40, %41, %cst_8 {dimension_numbers = #tpu.dot_dimension_numbers<[1], [0], [0], [1], [0, 0, 1, 1], [], []>} : vector<8x32xbf16>, vector<32x64xbf16>, vector<8x64xf32> -> vector<8x64xf32>
    %c0_9 = arith.constant 0 : index
    %c0_10 = arith.constant 0 : index
    %43 = vector.load %arg5[%c0_9, %c0_10] : memref<1x64xf32, #tpu.memory_space<vmem>>, vector<1x64xf32>
    %44 = vector.broadcast %43 : vector<1x64xf32> to vector<8x64xf32>
    %45 = arith.addf %42, %44 : vector<8x64xf32>
    %cst_11 = arith.constant 0.000000e+00 : f32
    %46 = vector.broadcast %cst_11 : f32 to vector<8x64xf32>
    %47 = arith.cmpf ogt, %45, %46 : vector<8x64xf32>
    %48 = math.exp %45 : vector<8x64xf32>
    %cst_12 = arith.constant 1.000000e+00 : f32
    %49 = vector.broadcast %cst_12 : f32 to vector<8x64xf32>
    %50 = arith.subf %48, %49 : vector<8x64xf32>
    %51 = arith.select %47, %45, %50 : vector<8x64xi1>, vector<8x64xf32>
    %52 = arith.truncf %51 : vector<8x64xf32> to vector<8x64xbf16>
    %c0_13 = arith.constant 0 : index
    %c0_14 = arith.constant 0 : index
    %53 = vector.load %arg6[%c0_13, %c0_14] : memref<64x128xbf16, #tpu.memory_space<vmem>>, vector<64x128xbf16>
    %cst_15 = arith.constant dense<0.000000e+00> : vector<8x128xf32>
    %54 = tpu.matmul %52, %53, %cst_15 {dimension_numbers = #tpu.dot_dimension_numbers<[1], [0], [0], [1], [0, 0, 1, 1], [], []>} : vector<8x64xbf16>, vector<64x128xbf16>, vector<8x128xf32> -> vector<8x128xf32>
    %c0_16 = arith.constant 0 : index
    %c0_17 = arith.constant 0 : index
    %55 = vector.load %arg7[%c0_16, %c0_17] : memref<1x128xf32, #tpu.memory_space<vmem>>, vector<1x128xf32>
    %56 = vector.broadcast %55 : vector<1x128xf32> to vector<8x128xf32>
    %57 = arith.addf %54, %56 : vector<8x128xf32>
    %cst_18 = arith.constant 0.000000e+00 : f32
    %58 = vector.broadcast %cst_18 : f32 to vector<8x128xf32>
    %59 = arith.cmpf ogt, %57, %58 : vector<8x128xf32>
    %60 = math.exp %57 : vector<8x128xf32>
    %cst_19 = arith.constant 1.000000e+00 : f32
    %61 = vector.broadcast %cst_19 : f32 to vector<8x128xf32>
    %62 = arith.subf %60, %61 : vector<8x128xf32>
    %63 = arith.select %59, %57, %62 : vector<8x128xi1>, vector<8x128xf32>
    %64 = arith.truncf %63 : vector<8x128xf32> to vector<8x128xbf16>
    %c0_20 = arith.constant 0 : index
    %c0_21 = arith.constant 0 : index
    %65 = vector.load %arg8[%c0_20, %c0_21] : memref<128x256xbf16, #tpu.memory_space<vmem>>, vector<128x256xbf16>
    %cst_22 = arith.constant dense<0.000000e+00> : vector<8x256xf32>
    %66 = tpu.matmul %64, %65, %cst_22 {dimension_numbers = #tpu.dot_dimension_numbers<[1], [0], [0], [1], [0, 0, 1, 1], [], []>} : vector<8x128xbf16>, vector<128x256xbf16>, vector<8x256xf32> -> vector<8x256xf32>
    %c0_23 = arith.constant 0 : index
    %c0_24 = arith.constant 0 : index
    %67 = vector.load %arg9[%c0_23, %c0_24] : memref<1x256xf32, #tpu.memory_space<vmem>>, vector<1x256xf32>
    %68 = vector.broadcast %67 : vector<1x256xf32> to vector<8x256xf32>
    %69 = arith.addf %66, %68 : vector<8x256xf32>
    %cst_25 = arith.constant 0.000000e+00 : f32
    %70 = vector.broadcast %cst_25 : f32 to vector<8x256xf32>
    %71 = arith.cmpf ogt, %69, %70 : vector<8x256xf32>
    %72 = math.exp %69 : vector<8x256xf32>
    %cst_26 = arith.constant 1.000000e+00 : f32
    %73 = vector.broadcast %cst_26 : f32 to vector<8x256xf32>
    %74 = arith.subf %72, %73 : vector<8x256xf32>
    %75 = arith.select %71, %69, %74 : vector<8x256xi1>, vector<8x256xf32>
    %76 = arith.truncf %75 : vector<8x256xf32> to vector<8x256xbf16>
    %c0_27 = arith.constant 0 : index
    %c0_28 = arith.constant 0 : index
    %77 = vector.load %arg10[%c0_27, %c0_28] : memref<256x256xbf16, #tpu.memory_space<vmem>>, vector<256x256xbf16>
    %cst_29 = arith.constant dense<0.000000e+00> : vector<8x256xf32>
    %78 = tpu.matmul %76, %77, %cst_29 {dimension_numbers = #tpu.dot_dimension_numbers<[1], [0], [0], [1], [0, 0, 1, 1], [], []>} : vector<8x256xbf16>, vector<256x256xbf16>, vector<8x256xf32> -> vector<8x256xf32>
    %c0_30 = arith.constant 0 : index
    %c0_31 = arith.constant 0 : index
    %79 = vector.load %arg11[%c0_30, %c0_31] : memref<1x256xf32, #tpu.memory_space<vmem>>, vector<1x256xf32>
    %80 = vector.broadcast %79 : vector<1x256xf32> to vector<8x256xf32>
    %81 = arith.addf %78, %80 : vector<8x256xf32>
    %cst_32 = arith.constant 0.000000e+00 : f32
    %82 = vector.broadcast %cst_32 : f32 to vector<8x256xf32>
    %83 = arith.cmpf ogt, %81, %82 : vector<8x256xf32>
    %84 = math.exp %81 : vector<8x256xf32>
    %cst_33 = arith.constant 1.000000e+00 : f32
    %85 = vector.broadcast %cst_33 : f32 to vector<8x256xf32>
    %86 = arith.subf %84, %85 : vector<8x256xf32>
    %87 = arith.select %83, %81, %86 : vector<8x256xi1>, vector<8x256xf32>
    %88 = arith.truncf %87 : vector<8x256xf32> to vector<8x256xbf16>
    %c0_34 = arith.constant 0 : index
    %c0_35 = arith.constant 0 : index
    %89 = vector.load %arg12[%c0_34, %c0_35] : memref<256x128xbf16, #tpu.memory_space<vmem>>, vector<256x128xbf16>
    %cst_36 = arith.constant dense<0.000000e+00> : vector<8x128xf32>
    %90 = tpu.matmul %88, %89, %cst_36 {dimension_numbers = #tpu.dot_dimension_numbers<[1], [0], [0], [1], [0, 0, 1, 1], [], []>} : vector<8x256xbf16>, vector<256x128xbf16>, vector<8x128xf32> -> vector<8x128xf32>
    %c0_37 = arith.constant 0 : index
    %c0_38 = arith.constant 0 : index
    %91 = vector.load %arg13[%c0_37, %c0_38] : memref<1x128xf32, #tpu.memory_space<vmem>>, vector<1x128xf32>
    %92 = vector.broadcast %91 : vector<1x128xf32> to vector<8x128xf32>
    %93 = arith.addf %90, %92 : vector<8x128xf32>
    %c0_39 = arith.constant 0 : index
    %c0_40 = arith.constant 0 : index
    %94 = vector.load %arg14[%c0_39, %c0_40] : memref<8x128xf32, #tpu.memory_space<vmem>>, vector<8x128xf32>
    tpu.vector_store %arg14[%c0_39, %c0_40], %93 {strides = array<i32>} : memref<8x128xf32, #tpu.memory_space<vmem>>, vector<8x128xf32>,
    return
  }
  func.func @transform_0(%arg0: i32) -> (i32, i32) {
    %c0_i32 = arith.constant 0 : i32
    %c0_i32_0 = arith.constant 0 : i32
    return %arg0, %c0_i32 : i32, i32
  }
  func.func @transform_1(%arg0: i32) -> (i32, i32) {
    %c0_i32 = arith.constant 0 : i32
    %c0_i32_0 = arith.constant 0 : i32
    %c0_i32_1 = arith.constant 0 : i32
    return %c0_i32, %c0_i32_0 : i32, i32
  }
  func.func @transform_2(%arg0: i32) -> (i32, i32) {
    %c0_i32 = arith.constant 0 : i32
    %c0_i32_0 = arith.constant 0 : i32
    %c0_i32_1 = arith.constant 0 : i32
    return %c0_i32, %c0_i32_0 : i32, i32
  }
  func.func @transform_3(%arg0: i32) -> (i32, i32) {
    %c0_i32 = arith.constant 0 : i32
    %c0_i32_0 = arith.constant 0 : i32
    %c0_i32_1 = arith.constant 0 : i32
    return %c0_i32, %c0_i32_0 : i32, i32
  }
  func.func @transform_4(%arg0: i32) -> (i32, i32) {
    %c0_i32 = arith.constant 0 : i32
    %c0_i32_0 = arith.constant 0 : i32
    %c0_i32_1 = arith.constant 0 : i32
    return %c0_i32, %c0_i32_0 : i32, i32
  }
  func.func @transform_5(%arg0: i32) -> (i32, i32) {
    %c0_i32 = arith.constant 0 : i32
    %c0_i32_0 = arith.constant 0 : i32
    %c0_i32_1 = arith.constant 0 : i32
    return %c0_i32, %c0_i32_0 : i32, i32
  }
  func.func @transform_6(%arg0: i32) -> (i32, i32) {
    %c0_i32 = arith.constant 0 : i32
    %c0_i32_0 = arith.constant 0 : i32
    %c0_i32_1 = arith.constant 0 : i32
    return %c0_i32, %c0_i32_0 : i32, i32
  }
  func.func @transform_7(%arg0: i32) -> (i32, i32) {
    %c0_i32 = arith.constant 0 : i32
    %c0_i32_0 = arith.constant 0 : i32
    %c0_i32_1 = arith.constant 0 : i32
    return %c0_i32, %c0_i32_0 : i32, i32
  }
  func.func @transform_8(%arg0: i32) -> (i32, i32) {
    %c0_i32 = arith.constant 0 : i32
    %c0_i32_0 = arith.constant 0 : i32
    %c0_i32_1 = arith.constant 0 : i32
    return %c0_i32, %c0_i32_0 : i32, i32
  }
  func.func @transform_9(%arg0: i32) -> (i32, i32) {
    %c0_i32 = arith.constant 0 : i32
    %c0_i32_0 = arith.constant 0 : i32
    %c0_i32_1 = arith.constant 0 : i32
    return %c0_i32, %c0_i32_0 : i32, i32
  }
  func.func @transform_10(%arg0: i32) -> (i32, i32) {
    %c0_i32 = arith.constant 0 : i32
    %c0_i32_0 = arith.constant 0 : i32
    %c0_i32_1 = arith.constant 0 : i32
    return %c0_i32, %c0_i32_0 : i32, i32
  }
  func.func @transform_11(%arg0: i32) -> (i32, i32) {
    %c0_i32 = arith.constant 0 : i32
    %c0_i32_0 = arith.constant 0 : i32
    %c0_i32_1 = arith.constant 0 : i32
    return %c0_i32, %c0_i32_0 : i32, i32
  }
  func.func @transform_12(%arg0: i32) -> (i32, i32) {
    %c0_i32 = arith.constant 0 : i32
    %c0_i32_0 = arith.constant 0 : i32
    %c0_i32_1 = arith.constant 0 : i32
    return %c0_i32, %c0_i32_0 : i32, i32
  }
  func.func @transform_13(%arg0: i32) -> (i32, i32) {
    %c0_i32 = arith.constant 0 : i32
    %c0_i32_0 = arith.constant 0 : i32
    return %arg0, %c0_i32 : i32, i32
  }
}

</mosaic_0001>

<bundles_post_ra>
// kernel: pod_ann_forward.1
= control target key start
LH: loop header
LB: loop body
LE: loop exit
PB: predicated region body
PF: predicated region fallthrough
CT: control target
= control target key end

     0   :  { %v1188_v1 = vmov 0   ;;  %v1189_v2 = vmov 2   ;;  %v1190_v3 = vmov 4   ;;  %s1645_s0 = inlined_call_operand.vmem [shape: f32[8,5], index: 0, kind: input, shape index: {}]   ;;  %s1646_s1 = inlined_call_operand.vmem [shape: f32[5,32], index: 1, kind: input, shape index: {}]   ;;  %s1647_s2 = inlined_call_operand.vmem [shape: f32[1,32], index: 2, kind: input, shape index: {}]   ;;  %s1648_s3 = inlined_call_operand.vmem [shape: bf16[32,64], index: 3, kind: input, shape index: {}]   ;;  %s1649_s4 = inlined_call_operand.vmem [shape: f32[1,64], index: 4, kind: input, shape index: {}]   ;;  %s1650_s5 = inlined_call_operand.vmem [shape: bf16[64,128], index: 5, kind: input, shape index: {}]   ;;  %s1651_s6 = inlined_call_operand.vmem [shape: f32[1,128], index: 6, kind: input, shape index: {}]   ;;  %s1652_s7 = inlined_call_operand.vmem [shape: bf16[128,256], index: 7, kind: input, shape index: {}]   ;;  %s1653_s8 = inlined_call_operand.vmem [shape: f32[1,256], index: 8, kind: input, shape index: {}]   ;;  %s1654_s9 = inlined_call_operand.vmem [shape: bf16[256,256], index: 9, kind: input, shape index: {}]   ;;  %s1655_s10 = inlined_call_operand.vmem [shape: f32[1,256], index: 10, kind: input, shape index: {}]   ;;  %s1656_s11 = inlined_call_operand.vmem [shape: bf16[256,128], index: 11, kind: input, shape index: {}]   ;;  %s1657_s12 = inlined_call_operand.vmem [shape: f32[1,128], index: 12, kind: input, shape index: {}]   ;;  %s1658_s13 = inlined_call_operand.hbm [shape: f32[8,128], index: 13, kind: output, shape index: {}]  }
   0x1   :  { %v46_v0 = vld [vmem:[%s1645_s0] sm:$0xff]  ;;  %1138 = vset.pattern.permute.xlu0 %v1188_v1  ;;  %1140 = vset.pattern.permute.xlu1 %v1189_v2 }
   0x2   :  { %51 = vperm.xlu0 %1138, %v46_v0   ;;  %68 = vperm.xlu1 %1140, %v46_v0  }
   0x3   :  { %1142 = vset.pattern.permute.xlu2 %v1190_v3 }
   0x4   :  { %18 = vsyncpa [#allocation3], 0  ;;  %82 = vperm.xlu2 %1142, %v46_v0   ;;  %v1191_v4 = vmov 1   ;;  %v1192_v5 = vmov 3   ;;  %v1063_v6 = vld [vmem:[%s1648_s3 + $0x8] sm:$0xff]  ;;  %v1062_v7 = vld [vmem:[%s1648_s3] sm:$0xff] }
   0x5   :  { %124 = vmatpush.bf16.msra.mxu0 %v1063_v6  ;;  %v47_v8 = vld [vmem:[%s1646_s1] sm:$0x1f]  ;;  %vm114_vm1 = vcmask 261120   ;;  %v1067_v35 = vld [vmem:[%s1650_s5 + $0x18] sm:$0xff]  ;;  %v1066_v36 = vld [vmem:[%s1650_s5 + $0x10] sm:$0xff]  ;;  %vm173_vm3 = vcmask 523264  }
   0x6   :  { %v54_v11 = vperm.slane %v47_v8, 0  ;;  %v1144_v12 = vld [vmem:[%s1647_s2] ss:$0 sm:$0xff]  ;;  %v64_v14 = vperm.slane %v47_v8, 1  ;;  %v71_v15 = vperm.slane %v47_v8, 2  ;;  %v78_v16 = vperm.slane %v47_v8, 3  ;;  %181 = vmatpush.bf16.msra.mxu1 %v1067_v35 }
   0x7   :  { %v85_v21 = vperm.slane %v47_v8, 4  ;;  %v1065_v37 = vld [vmem:[%s1650_s5 + $0x8] sm:$0xff]  ;;  %v1064_v38 = vld [vmem:[%s1650_s5] sm:$0xff]  ;;  %v860_v39 = vld [vmem:[%s1652_s7 + $0x70] sm:$0xf]  ;;  %s1193_s15 = smov [#allocation2]  }
   0x8   :  { %v1083_v40 = vld [vmem:[%s1652_s7 + $0x74] sm:$0xf0]  ;;  %v1082_v41 = vld [vmem:[%s1652_s7 + $0x74] sm:$0xf]  ;;  %v862_v43 = vld [vmem:[%s1652_s7 + $0x78] sm:$0xf0] }
   0x9   :  { %125 = vmatpush.bf16.msra.mxu0 %v1062_v7  ;;  %v861_v42 = vor.u32 %v1083_v40, %v860_v39  ;;  %v852_v44 = vld [vmem:[%s1652_s7 + $0x60] sm:$0xf]  ;;  %v1081_v45 = vld [vmem:[%s1652_s7 + $0x64] sm:$0xf0]  ;;  %v865_v46 = vor.u32 %v1082_v41, %v862_v43  ;;  %v1080_v47 = vld [vmem:[%s1652_s7 + $0x64] sm:$0xf] }
   0xa   :  { %1139 = vset.pattern.permute.xlu0 %v1191_v4  ;;  %1141 = vset.pattern.permute.xlu1 %v1192_v5  ;;  %v854_v48 = vld [vmem:[%s1652_s7 + $0x68] sm:$0xf0]  ;;  %v853_v49 = vor.u32 %v1081_v45, %v852_v44  ;;  %v844_v51 = vld [vmem:[%s1652_s7 + $0x50] sm:$0xf]  ;;  %v1079_v52 = vld [vmem:[%s1652_s7 + $0x54] sm:$0xf0] }
   0xb   :  { %61 = vperm.xlu0 %1139, %v46_v0   ;;  %75 = vperm.xlu1 %1141, %v46_v0   ;;  %v857_v50 = vor.u32 %v1080_v47, %v854_v48  ;;  %v1078_v53 = vld [vmem:[%s1652_s7 + $0x54] sm:$0xf]  ;;  %v846_v54 = vld [vmem:[%s1652_s7 + $0x58] sm:$0xf0]  ;;  %v845_v55 = vor.u32 %v1079_v52, %v844_v51  ;;  %v836_v57 = vld [vmem:[%s1652_s7 + $0x40] sm:$0xf] }
   0xc   :  { %182 = vmatpush.bf16.msra.mxu1 %v1066_v36  ;;  %298 = vmatpush.bf16.msra.mxu2 %v861_v42  ;;  %v849_v56 = vor.u32 %v1078_v53, %v846_v54  ;;  %v1077_v58 = vld [vmem:[%s1652_s7 + $0x44] sm:$0xf0]  ;;  %v1076_v59 = vld [vmem:[%s1652_s7 + $0x44] sm:$0xf]  ;;  %v838_v60 = vld [vmem:[%s1652_s7 + $0x48] sm:$0xf0] }
   0xd   :  { %311 = vmatpush.bf16.msra.mxu3 %v865_v46  ;;  %v837_v61 = vor.u32 %v1077_v58, %v836_v57  ;;  %v1145_v62 = vld [vmem:[%s1649_s4] ss:$0 sm:$0xff]  ;;  %v841_v63 = vor.u32 %v1076_v59, %v838_v60  ;;  %v828_v8 = vld [vmem:[%s1652_s7 + $0x30] sm:$0xf]  ;;  %v1115_v36 = vld [vmem:[%s1654_s9 + $0xf4] sm:$0xf0] }
   0xe   :  { %v1114_v41 = vld [vmem:[%s1654_s9 + $0xf4] sm:$0xf]  ;;  %v992_v42 = vld [vmem:[%s1654_s9 + $0xf8] sm:$0xf0]  ;;  %v918_v43 = vld [vmem:[%s1654_s9 + $0x60] sm:$0xf] }
   0xf   :  { %v995_v44 = vor.u32 %v1114_v41, %v992_v42  ;;  %v1097_v45 = vld [vmem:[%s1654_s9 + $0x64] sm:$0xf0]  ;;  %v982_v46 = vld [vmem:[%s1654_s9 + $0xe0] sm:$0xf]  ;;  %v920_v51 = vld [vmem:[%s1654_s9 + $0x68] sm:$0xf0] }
  0x10   :  { %183 = vmatpush.bf16.msra.mxu1 %v1065_v37  ;;  %299 = vmatpush.bf16.msra.mxu2 %v853_v49  ;;  %v1098_v37 = vld [vmem:[%s1654_s9 + $0x74] sm:$0xf]  ;;  %v1113_v47 = vld [vmem:[%s1654_s9 + $0xe4] sm:$0xf0]  ;;  %v919_v48 = vor.u32 %v1097_v45, %v918_v43  ;;  %v1112_v52 = vld [vmem:[%s1654_s9 + $0xe4] sm:$0xf] }
  0x11   :  { %312 = vmatpush.bf16.msra.mxu3 %v857_v50  ;;  %v983_v49 = vor.u32 %v1113_v47, %v982_v46  ;;  %v1096_v50 = vld [vmem:[%s1654_s9 + $0x64] sm:$0xf]  ;;  %v984_v54 = vld [vmem:[%s1654_s9 + $0xe8] sm:$0xf0]  ;;  %v974_v58 = vld [vmem:[%s1654_s9 + $0xd0] sm:$0xf] }
  0x12   :  { %v923_v53 = vor.u32 %v1096_v50, %v920_v51  ;;  %v987_v57 = vor.u32 %v1112_v52, %v984_v54  ;;  %v1111_v59 = vld [vmem:[%s1654_s9 + $0xd4] sm:$0xf0]  ;;  %v1094_v60 = vld [vmem:[%s1654_s9 + $0x54] sm:$0xf]  ;;  %v1105_v41 = vld [vmem:[%s1654_s9 + $0xa4] sm:$0xf0] }
  0x13   :  { %1143 = vset.pattern.permute.xlu0 %v1190_v3  ;;  %v1088_v42 = vld [vmem:[%s1654_s9 + $0x24] sm:$0xf]  ;;  %v888_v43 = vld [vmem:[%s1654_s9 + $0x28] sm:$0xf0]  ;;  %v1087_v50 = vld [vmem:[%s1654_s9 + $0x14] sm:$0xf0] }
  0x14   :  { %184 = vmatpush.bf16.msra.mxu1 %v1064_v38  ;;  %300 = vmatpush.bf16.msra.mxu2 %v845_v55  ;;  %v928_v38 = vld [vmem:[%s1654_s9 + $0x78] sm:$0xf0]  ;;  %v910_v55 = vld [vmem:[%s1654_s9 + $0x50] sm:$0xf]  ;;  %v891_v45 = vor.u32 %v1088_v42, %v888_v43  ;;  %v1104_v46 = vld [vmem:[%s1654_s9 + $0xa4] sm:$0xf] }
  0x15   :  { %313 = vmatpush.bf16.msra.mxu3 %v849_v56  ;;  %v931_v40 = vor.u32 %v1098_v37, %v928_v38  ;;  %v1095_v56 = vld [vmem:[%s1654_s9 + $0x54] sm:$0xf0]  ;;  %v886_v37 = vld [vmem:[%s1654_s9 + $0x20] sm:$0xf]  ;;  %v1089_v38 = vld [vmem:[%s1654_s9 + $0x24] sm:$0xf0] }
  0x16   :  { %v952_v47 = vld [vmem:[%s1654_s9 + $0xa8] sm:$0xf0]  ;;  %v942_v51 = vld [vmem:[%s1654_s9 + $0x90] sm:$0xf]  ;;  %v1086_v54 = vld [vmem:[%s1654_s9 + $0x14] sm:$0xf] }
  0x17   :  { %v1125_v42 = vld [vmem:[%s1656_s11 + $0x48] sm:$0xff]  ;;  %v1124_v43 = vld [vmem:[%s1656_s11 + $0x40] sm:$0xff]  ;;  %s762_s16 = sshll.u32 %s1193_s15, 4  ;;  %s763_s16 = int_to_ptr.vmem [resolvable:$true] %s762_s16 }
  0x18   :  { %301 = vmatpush.bf16.msra.mxu2 %v837_v61  ;;  %v911_v61 = vor.u32 %v1095_v56, %v910_v55  ;;  %v880_v55 = vld [vmem:[%s1654_s9 + $0x18] sm:$0xf0] }
  0x19   :  { %314 = vmatpush.bf16.msra.mxu3 %v841_v63  ;;  %v1110_v63 = vld [vmem:[%s1654_s9 + $0xd4] sm:$0xf] }
  0x5e   :  { %v83_v22 = vpop.permute.xlu2 %82 }
  0x5f   :  { %v86_v27 = vmul.f32 %v85_v21, %v83_v22  ;;  %v1071_v21 = vld [vmem:[%s1652_s7 + $0x14] sm:$0xf0]  ;;  %v1070_v22 = vld [vmem:[%s1652_s7 + $0x14] sm:$0xf] }
  0x74   :  { %v52_v9 = vpop.permute.xlu0 %51  ;;  %v69_v10 = vpop.permute.xlu1 %68 }
  0x75   :  { %v55_v13 = vmul.f32 %v54_v11, %v52_v9  ;;  %v72_v23 = vmul.f32 %v71_v15, %v69_v10  ;;  %v1075_v9 = vld [vmem:[%s1652_s7 + $0x34] sm:$0xf0]  ;;  %v1074_v10 = vld [vmem:[%s1652_s7 + $0x34] sm:$0xf]  ;;  %v1073_v15 = vld [vmem:[%s1652_s7 + $0x24] sm:$0xf0] }
  0x76   :  { %v829_v11 = vor.u32 %v1075_v9, %v828_v8  ;;  %v1092_v8 = vld [vmem:[%s1654_s9 + $0x44] sm:$0xf]  ;;  %v904_v9 = vld [vmem:[%s1654_s9 + $0x48] sm:$0xf0] }
  0x77   :  { %v59_v19 = vadd.f32 %v1144_v12, %v55_v13  ;;  %v830_v12 = vld [vmem:[%s1652_s7 + $0x38] sm:$0xf0] }
  0x78   :  { %v833_v13 = vor.u32 %v1074_v10, %v830_v12  ;;  %302 = vmatpush.bf16.msra.mxu2 %v829_v11  ;;  %v1108_v10 = vld [vmem:[%s1654_s9 + $0xc4] sm:$0xf]  ;;  %v968_v11 = vld [vmem:[%s1654_s9 + $0xc8] sm:$0xf0] }
  0x7a   :  { %315 = vmatpush.bf16.msra.mxu3 %v833_v13  ;;  %v1146_v13 = vld [vmem:[%s1651_s6] ss:$0 sm:$0xff]  ;;  %s764_s6 = sshll.u32 %s1658_s13, 4  ;;  %s765_s6 = int_to_ptr.hbm [resolvable:$true] %s764_s6 }
  0x7d   :  { %v62_v17 = vpop.permute.xlu0 %61  ;;  %v76_v18 = vpop.permute.xlu1 %75 }
  0x7e   :  { %v65_v20 = vmul.f32 %v64_v14, %v62_v17  ;;  %v79_v25 = vmul.f32 %v78_v16, %v76_v18  ;;  %v820_v14 = vld [vmem:[%s1652_s7 + $0x20] sm:$0xf]  ;;  %v1072_v16 = vld [vmem:[%s1652_s7 + $0x24] sm:$0xf]  ;;  %v822_v18 = vld [vmem:[%s1652_s7 + $0x28] sm:$0xf0] }
  0x7f   :  { %v821_v17 = vor.u32 %v1073_v15, %v820_v14  ;;  %v907_v15 = vor.u32 %v1092_v8, %v904_v9  ;;  %v1123_v9 = vld [vmem:[%s1656_s11 + $0x38] sm:$0xff] }
  0x80   :  { %v66_v24 = vadd.f32 %v65_v20, %v59_v19  ;;  %v825_v19 = vor.u32 %v1072_v16, %v822_v18  ;;  %v812_v20 = vld [vmem:[%s1652_s7 + $0x10] sm:$0xf]  ;;  %v971_v16 = vor.u32 %v1108_v10, %v968_v11  ;;  %v1131_v10 = vld [vmem:[%s1656_s11 + $0x78] sm:$0xff] }
  0x81   :  { %303 = vmatpush.bf16.msra.mxu2 %v821_v17  ;;  %v1122_v11 = vld [vmem:[%s1656_s11 + $0x30] sm:$0xff] }
  0x82   :  { %v73_v26 = vadd.f32 %v72_v23, %v66_v24  ;;  %316 = vmatpush.bf16.msra.mxu3 %v825_v19  ;;  %v813_v23 = vor.u32 %v1071_v21, %v812_v20  ;;  %v814_v24 = vld [vmem:[%s1652_s7 + $0x18] sm:$0xf0] }
  0x84   :  { %v80_v28 = vadd.f32 %v79_v25, %v73_v26  ;;  %v804_v25 = vld [vmem:[%s1652_s7] sm:$0xf]  ;;  %v1069_v26 = vld [vmem:[%s1652_s7 + $0x4] sm:$0xf0] }
  0x85   :  { %304 = vmatpush.bf16.msra.mxu2 %v813_v23 }
  0x86   :  { %v87_v29 = vadd.f32 %v86_v27, %v80_v28  ;;  %v817_v27 = vor.u32 %v1070_v22, %v814_v24  ;;  %v1068_v28 = vld [vmem:[%s1652_s7 + $0x4] sm:$0xf] }
  0x88   :  { %v89_v30 = vmul.f32 1.442695, %v87_v29  ;;  %vm88_vm0 = vcmp.gt.f32.partialorder %v87_v29, 0.0  ;;  %317 = vmatpush.bf16.msra.mxu3 %v817_v27  ;;  %v958_v27 = vld [vmem:[%s1654_s9 + $0xb0] sm:$0xf] }
  0x8a   :  { %1148 = vpow2.f32 %v89_v30  ;;  %v805_v30 = vor.u32 %v1069_v26, %v804_v25  ;;  %v894_v25 = vld [vmem:[%s1654_s9 + $0x30] sm:$0xf]  ;;  %v1091_v26 = vld [vmem:[%s1654_s9 + $0x34] sm:$0xf0] }
  0x8c   :  { %305 = vmatpush.bf16.msra.mxu2 %v805_v30  ;;  %v1090_v30 = vld [vmem:[%s1654_s9 + $0x34] sm:$0xf] }
  0x90   :  { %v1149_v31 = vpop.eup %1148  ;;  %560 = vmatpush.bf16.msrb.mxu2 %v931_v40  ;;  %v887_v40 = vor.u32 %v1089_v38, %v886_v37  ;;  %v1118_v37 = vld [vmem:[%s1656_s11 + $0x10] sm:$0xff]  ;;  %v1127_v38 = vld [vmem:[%s1656_s11 + $0x58] sm:$0xff] }
  0x91   :  { %v773_v32 = vadd.f32 -1.0, %v1149_v31 }
  0x93   :  { %v92_v33 = vsel %vm88_vm0, %v87_v29, %v773_v32  ;;  %v806_v29 = vld [vmem:[%s1652_s7 + $0x8] sm:$0xf0]  ;;  %v926_v32 = vld [vmem:[%s1654_s9 + $0x70] sm:$0xf] }
  0x94   :  { %v93_v34 = vpack.c.bf16 %v92_v33, %v92_v33  ;;  %v809_v31 = vor.u32 %v1068_v28, %v806_v29  ;;  %v1099_v33 = vld [vmem:[%s1654_s9 + $0x74] sm:$0xf0]  ;;  %561 = vmatpush.bf16.msrb.mxu2 %v923_v53  ;;  %v895_v28 = vor.u32 %v1091_v26, %v894_v25 }
  0x95   :  { %v927_v35 = vor.u32 %v1099_v33, %v926_v32  ;;  %v1107_v29 = vld [vmem:[%s1654_s9 + $0xb4] sm:$0xf0] }
  0x96   :  { %782 = vmatmul.msk.bf16.vlgmr.msra.gmra.mxu0 %vm114_vm1, %v93_v34  ;;  %318 = vmatpush.bf16.msra.mxu3 %v809_v31  ;;  %v990_v34 = vld [vmem:[%s1654_s9 + $0xf0] sm:$0xf]  ;;  %v896_v31 = vld [vmem:[%s1654_s9 + $0x38] sm:$0xf0]  ;;  %v959_v32 = vor.u32 %v1107_v29, %v958_v27  ;;  %v1103_v53 = vld [vmem:[%s1654_s9 + $0x94] sm:$0xf0] }
  0x97   :  { %v991_v39 = vor.u32 %v1115_v36, %v990_v34  ;;  %534 = vmatpush.bf16.msrb.mxu0 %v927_v35  ;;  %v899_v33 = vor.u32 %v1090_v30, %v896_v31  ;;  %v1106_v34 = vld [vmem:[%s1654_s9 + $0xb4] sm:$0xf]  ;;  %v960_v35 = vld [vmem:[%s1654_s9 + $0xb8] sm:$0xf0]  ;;  %v943_v56 = vor.u32 %v1103_v53, %v942_v51 }
  0x98   :  { %v963_v36 = vor.u32 %v1106_v34, %v960_v35  ;;  %v1129_v34 = vld [vmem:[%s1656_s11 + $0x68] sm:$0xff]  ;;  %v1119_v35 = vld [vmem:[%s1656_s11 + $0x18] sm:$0xff] }
  0x99   :  { %547 = vmatpush.bf16.msrb.mxu1 %v991_v39  ;;  %v950_v39 = vld [vmem:[%s1654_s9 + $0xa0] sm:$0xf] }
  0x9a   :  { %573 = vmatpush.bf16.msrb.mxu3 %v995_v44  ;;  %v951_v44 = vor.u32 %v1105_v41, %v950_v39  ;;  %v1117_v39 = vld [vmem:[%s1656_s11 + $0x8] sm:$0xff]  ;;  %v1116_v41 = vld [vmem:[%s1656_s11] sm:$0xff] }
  0x9b   :  { %535 = vmatpush.bf16.msrb.mxu0 %v919_v48  ;;  %v955_v48 = vor.u32 %v1104_v46, %v952_v47 }
  0x9d   :  { %548 = vmatpush.bf16.msrb.mxu1 %v983_v49  ;;  %v878_v49 = vld [vmem:[%s1654_s9 + $0x10] sm:$0xf] }
  0x9e   :  { %574 = vmatpush.bf16.msrb.mxu3 %v987_v57  ;;  %v879_v52 = vor.u32 %v1087_v50, %v878_v49  ;;  %v883_v57 = vor.u32 %v1086_v54, %v880_v55 }
  0x9f   :  { %536 = vmatpush.bf16.msrb.mxu0 %v911_v61  ;;  %v870_v61 = vld [vmem:[%s1654_s9] sm:$0xf] }
 0x113   :  { %v127_v0 = vpop.f32.mrf.mxu0 }
 0x114   :  { %v128_v1 = vadd.f32 %v1145_v62, %v127_v0  ;;  %v912_v62 = vld [vmem:[%s1654_s9 + $0x58] sm:$0xf0] }
 0x115   :  { %v976_v0 = vld [vmem:[%s1654_s9 + $0xd8] sm:$0xf0] }
 0x116   :  { %v132_v2 = vmul.f32 1.442695, %v128_v1  ;;  %vm131_vm2 = vcmp.gt.f32.partialorder %v128_v1, 0.0 }
 0x118   :  { %1150 = vpow2.f32 %v132_v2  ;;  %v915_v2 = vor.u32 %v1094_v60, %v912_v62  ;;  %v1085_v62 = vld [vmem:[%s1654_s9 + $0x4] sm:$0xf0] }
 0x11a   :  { %562 = vmatpush.bf16.msrb.mxu2 %v915_v2  ;;  %v1084_v2 = vld [vmem:[%s1654_s9 + $0x4] sm:$0xf] }
 0x11b   :  { %v129_v3 = vpop.f32.mrf.mxu0 }
 0x11c   :  { %v902_v3 = vld [vmem:[%s1654_s9 + $0x40] sm:$0xf] }
 0x11e   :  { %v1151_v4 = vpop.eup %1150  ;;  %563 = vmatpush.bf16.msrb.mxu2 %v907_v15 }
 0x11f   :  { %v783_v5 = vadd.f32 -1.0, %v1151_v4  ;;  %v1093_v4 = vld [vmem:[%s1654_s9 + $0x44] sm:$0xf0] }
 0x120   :  { %v903_v12 = vor.u32 %v1093_v4, %v902_v3  ;;  %v872_v3 = vld [vmem:[%s1654_s9 + $0x8] sm:$0xf0] }
 0x121   :  { %v135_v6 = vsel %vm131_vm2, %v128_v1, %v783_v5  ;;  %v975_v1 = vor.u32 %v1111_v59, %v974_v58  ;;  %v966_v5 = vld [vmem:[%s1654_s9 + $0xc0] sm:$0xf]  ;;  %v1102_v58 = vld [vmem:[%s1654_s9 + $0x94] sm:$0xf]  ;;  %v944_v59 = vld [vmem:[%s1654_s9 + $0x98] sm:$0xf0] }
 0x122   :  { %v136_v7 = vpack.c.bf16 %v135_v6, %v135_v6  ;;  %v979_v6 = vor.u32 %v1110_v63, %v976_v0  ;;  %537 = vmatpush.bf16.msrb.mxu0 %v903_v12  ;;  %564 = vmatpush.bf16.msrb.mxu2 %v899_v33  ;;  %v947_v60 = vor.u32 %v1102_v58, %v944_v59  ;;  %v934_v63 = vld [vmem:[%s1654_s9 + $0x80] sm:$0xf]  ;;  %v1130_v12 = vld [vmem:[%s1656_s11 + $0x70] sm:$0xff] }
 0x123   :  { %549 = vmatpush.bf16.msrb.mxu1 %v975_v1  ;;  %v871_v0 = vor.u32 %v1085_v62, %v870_v61  ;;  %v1101_v1 = vld [vmem:[%s1654_s9 + $0x84] sm:$0xf0]  ;;  %v1120_v33 = vld [vmem:[%s1656_s11 + $0x20] sm:$0xff] }
 0x124   :  { %800 = vmatmul.msk.bf16.vlgmr.msra.gmra.mxu1 %vm173_vm3, %v136_v7  ;;  %v1109_v7 = vld [vmem:[%s1654_s9 + $0xc4] sm:$0xf0]  ;;  %575 = vmatpush.bf16.msrb.mxu3 %v979_v6  ;;  %v935_v4 = vor.u32 %v1101_v1, %v934_v63  ;;  %v1100_v6 = vld [vmem:[%s1654_s9 + $0x84] sm:$0xf] }
 0x125   :  { %v967_v14 = vor.u32 %v1109_v7, %v966_v5  ;;  %v875_v5 = vor.u32 %v1084_v2, %v872_v3  ;;  %v936_v7 = vld [vmem:[%s1654_s9 + $0x88] sm:$0xf0] }
 0x126   :  { %538 = vmatpush.bf16.msrb.mxu0 %v895_v28  ;;  %565 = vmatpush.bf16.msrb.mxu2 %v891_v45  ;;  %v939_v8 = vor.u32 %v1100_v6, %v936_v7  ;;  %v1147_v6 = vld [vmem:[%s1657_s12] ss:$0 sm:$0xff] }
 0x127   :  { %550 = vmatpush.bf16.msrb.mxu1 %v967_v14  ;;  %v212_v14 = vld [vmem:[%s1653_s8] sm:$0x3] }
 0x128   :  { %576 = vmatpush.bf16.msrb.mxu3 %v971_v16  ;;  %v214_v15 = vperm.slane %v212_v14, 0  ;;  %v215_v16 = vperm.slane %v212_v14, 1 }
 0x12a   :  { %539 = vmatpush.bf16.msrb.mxu0 %v887_v40  ;;  %566 = vmatpush.bf16.msrb.mxu2 %v883_v57  ;;  %v1126_v40 = vld [vmem:[%s1656_s11 + $0x50] sm:$0xff] }
 0x12b   :  { %551 = vmatpush.bf16.msrb.mxu1 %v959_v32 }
 0x12c   :  { %577 = vmatpush.bf16.msrb.mxu3 %v963_v36  ;;  %v1128_v36 = vld [vmem:[%s1656_s11 + $0x60] sm:$0xff] }
 0x12e   :  { %540 = vmatpush.bf16.msrb.mxu0 %v879_v52  ;;  %567 = vmatpush.bf16.msrb.mxu2 %v875_v5 }
 0x12f   :  { %552 = vmatpush.bf16.msrb.mxu1 %v951_v44  ;;  %v368_v44 = vld [vmem:[%s1655_s10] sm:$0x3] }
 0x130   :  { %578 = vmatpush.bf16.msrb.mxu3 %v955_v48  ;;  %v370_v45 = vperm.slane %v368_v44, 0  ;;  %v371_v50 = vperm.slane %v368_v44, 1 }
 0x132   :  { %541 = vmatpush.bf16.msrb.mxu0 %v871_v0 }
 0x133   :  { %553 = vmatpush.bf16.msrb.mxu1 %v943_v56 }
 0x134   :  { %579 = vmatpush.bf16.msrb.mxu3 %v947_v60 }
 0x136   :  { %730 = vmatpush.bf16.msra.mxu0 %v1123_v9 }
 0x137   :  { %554 = vmatpush.bf16.msrb.mxu1 %v935_v4 }
 0x138   :  { %580 = vmatpush.bf16.msrb.mxu3 %v939_v8 }
 0x13a   :  { %731 = vmatpush.bf16.msra.mxu0 %v1122_v11 }
 0x13b   :  { %743 = vmatpush.bf16.msra.mxu1 %v1131_v10 }
 0x13f   :  { %744 = vmatpush.bf16.msra.mxu1 %v1130_v12 }
 0x143   :  { %745 = vmatpush.bf16.msra.mxu1 %v1129_v34 }
 0x147   :  { %746 = vmatpush.bf16.msra.mxu1 %v1128_v36 }
 0x14b   :  { %747 = vmatpush.bf16.msra.mxu1 %v1127_v38 }
 0x14f   :  { %748 = vmatpush.bf16.msra.mxu1 %v1126_v40 }
 0x153   :  { %749 = vmatpush.bf16.msra.mxu1 %v1125_v42 }
 0x157   :  { %750 = vmatpush.bf16.msra.mxu1 %v1124_v43 }
 0x1a1   :  { %v186_v17 = vpop.f32.mrf.mxu1 }
 0x1a2   :  { %v187_v18 = vadd.f32 %v1146_v13, %v186_v17  ;;  %v1121_v13 = vld [vmem:[%s1656_s11 + $0x28] sm:$0xff] }
 0x1a3   :  { %732 = vmatpush.bf16.msra.mxu0 %v1121_v13 }
 0x1a4   :  { %v191_v19 = vmul.f32 1.442695, %v187_v18  ;;  %vm190_vm4 = vcmp.gt.f32.partialorder %v187_v18, 0.0 }
 0x1a6   :  { %1152 = vpow2.f32 %v191_v19 }
 0x1a7   :  { %733 = vmatpush.bf16.msra.mxu0 %v1120_v33 }
 0x1a9   :  { %v188_v20 = vpop.f32.mrf.mxu1 }
 0x1ab   :  { %734 = vmatpush.bf16.msra.mxu0 %v1119_v35 }
 0x1ac   :  { %v1153_v21 = vpop.eup %1152 }
 0x1ad   :  { %v801_v22 = vadd.f32 -1.0, %v1153_v21 }
 0x1af   :  { %v194_v23 = vsel %vm190_vm4, %v187_v18, %v801_v22  ;;  %735 = vmatpush.bf16.msra.mxu0 %v1118_v37 }
 0x1b0   :  { %v195_v24 = vpack.c.bf16 %v194_v23, %v194_v23 }
 0x1b2   :  { %306 = vmatmul.bf16.vlgmr.msra.gmra.mxu2 %v195_v24  ;;  %319 = vmatmul.bf16.vlgmr.msra.gmra.mxu3 %v195_v24 }
 0x1b3   :  { %736 = vmatpush.bf16.msra.mxu0 %v1117_v39 }
 0x1b7   :  { %737 = vmatpush.bf16.msra.mxu0 %v1116_v41 }
 0x235   :  { %v307_v17 = vpop.f32.mrf.mxu2  ;;  %v320_v18 = vpop.f32.mrf.mxu3 }
 0x236   :  { %v308_v19 = vadd.f32 %v307_v17, %v214_v15  ;;  %v321_v20 = vadd.f32 %v320_v18, %v215_v16 }
 0x238   :  { %v326_v21 = vmul.f32 1.442695, %v308_v19  ;;  %v328_v22 = vmul.f32 1.442695, %v321_v20  ;;  %vm324_vm5 = vcmp.gt.f32.partialorder %v308_v19, 0.0  ;;  %vm325_vm6 = vcmp.gt.f32.partialorder %v321_v20, 0.0 }
 0x23a   :  { %1154 = vpow2.f32 %v326_v21 }
 0x23b   :  { %1156 = vpow2.f32 %v328_v22 }
 0x23d   :  { %v309_v23 = vpop.f32.mrf.mxu2  ;;  %v322_v24 = vpop.f32.mrf.mxu3 }
 0x240   :  { %v1155_v25 = vpop.eup %1154 }
 0x241   :  { %v1157_v26 = vpop.eup %1156  ;;  %v866_v27 = vadd.f32 -1.0, %v1155_v25 }
 0x242   :  { %v867_v28 = vadd.f32 -1.0, %v1157_v26 }
 0x243   :  { %v332_v29 = vsel %vm324_vm5, %v308_v19, %v866_v27 }
 0x244   :  { %v334_v30 = vpack.c.bf16 %v332_v29, %v332_v29  ;;  %v333_v31 = vsel %vm325_vm6, %v321_v20, %v867_v28 }
 0x245   :  { %v335_v32 = vpack.c.bf16 %v333_v31, %v333_v31 }
 0x246   :  { %542 = vmatmul.bf16.vlgmr.msrb.gmra.mxu0 %v334_v30  ;;  %568 = vmatmul.bf16.vlgmr.msrb.gmra.mxu2 %v334_v30 }
 0x247   :  { %555 = vmatmul.bf16.vlgmr.msrb.gmra.mxu1 %v335_v32  ;;  %581 = vmatmul.bf16.vlgmr.msrb.gmra.mxu3 %v335_v32 }
 0x2c3   :  { %v543_v46 = vpop.f32.mrf.mxu0 }
 0x2c4   :  { %v544_v47 = vadd.f32 %v543_v46, %v370_v45  ;;  %v556_v48 = vpop.f32.mrf.mxu1 }
 0x2c6   :  { %v557_v49 = vadd.f32 %v556_v48, %v544_v47 }
 0x2c8   :  { %v588_v51 = vmul.f32 1.442695, %v557_v49  ;;  %vm586_vm7 = vcmp.gt.f32.partialorder %v557_v49, 0.0 }
 0x2c9   :  { %v569_v52 = vpop.f32.mrf.mxu2 }
 0x2ca   :  { %1158 = vpow2.f32 %v588_v51  ;;  %v570_v53 = vadd.f32 %v569_v52, %v371_v50  ;;  %v582_v54 = vpop.f32.mrf.mxu3 }
 0x2cb   :  { %v545_v55 = vpop.f32.mrf.mxu0 }
 0x2cc   :  { %v583_v56 = vadd.f32 %v582_v54, %v570_v53  ;;  %v558_v57 = vpop.f32.mrf.mxu1 }
 0x2ce   :  { %v590_v58 = vmul.f32 1.442695, %v583_v56  ;;  %vm587_vm8 = vcmp.gt.f32.partialorder %v583_v56, 0.0 }
 0x2d0   :  { %v1159_v59 = vpop.eup %1158  ;;  %1160 = vpow2.f32 %v590_v58 }
 0x2d1   :  { %v996_v60 = vadd.f32 -1.0, %v1159_v59  ;;  %v571_v61 = vpop.f32.mrf.mxu2 }
 0x2d2   :  { %v584_v62 = vpop.f32.mrf.mxu3 }
 0x2d3   :  { %v594_v63 = vsel %vm586_vm7, %v557_v49, %v996_v60 }
 0x2d4   :  { %v596_v0 = vpack.c.bf16 %v594_v63, %v594_v63 }
 0x2d6   :  { %v1161_v1 = vpop.eup %1160  ;;  %738 = vmatmul.bf16.vlgmr.msra.gmra.mxu0 %v596_v0 }
 0x2d7   :  { %v997_v2 = vadd.f32 -1.0, %v1161_v1 }
 0x2d9   :  { %v595_v3 = vsel %vm587_vm8, %v583_v56, %v997_v2 }
 0x2da   :  { %v597_v4 = vpack.c.bf16 %v595_v3, %v595_v3 }
 0x2dc   :  { %751 = vmatmul.bf16.vlgmr.msra.gmra.mxu1 %v597_v4 }
 0x353   :  { %v739_v5 = vpop.f32.mrf.mxu0 }
 0x354   :  { %v740_v7 = vadd.f32 %v1147_v6, %v739_v5 }
 0x359   :  { %v752_v8 = vpop.f32.mrf.mxu1 }
 0x35a   :  { %v753_v9 = vadd.f32 %v752_v8, %v740_v7 }
 0x35b   :  { %v741_v10 = vpop.f32.mrf.mxu0 }
 0x35c   :  { %756 = vst [vmem:[#allocation2] sm:$0xff] %v753_v9 }
 0x35d   :  { %767 = dma.vmem_to_hbm [thread:$0]  %s763_s16, 128, %s765_s6, [#allocation3]  }
 0x361   :  { %v754_v11 = vpop.f32.mrf.mxu1 }
 0x362   :  { %1186 = dma.done.wait [#allocation3], 128  }
 0x363   :  { %1187 = vsyncadd [#allocation3], 4294967168 }
 0x364   :  { %772 = vsyncpa [#allocation3], 1 }

</bundles_post_ra>
